<compile_context>
chip_gen: v7x
topology: tpu7x:2x2x1
jax: 0.10.0
libtpu: 0.0.40
codegen_flags: <defaults>
</compile_context>

<pallas_src>
import functools

import jax
import jax.numpy as jnp
from jax import lax
from jax.experimental import pallas as pl
from jax.experimental.pallas import tpu as pltpu

MIN_VAL = -1e15  # same value used by do_coattn's masked_fill
LANE = 128


def _vmem_limit_bytes():
    # ~3/4 of physical VMEM: ~96 MiB on v5e/v6e (128 MiB), ~48 MiB on v7x (64 MiB).
    try:
        cap = int(pltpu.get_tpu_info().vmem_capacity_bytes)
    except Exception:
        cap = 64 * 1024 * 1024  # conservative fallback (valid on every generation)
    return int(min(cap * 3 // 4, 100 * 1024 * 1024))


# ----------------------------------------------------------------------------
# Kernel 1: z = h @ W_fs^T + b_fs, tiled over rows (pipelined HBM<->VMEM).
# h / W are bf16 (MXU), accumulation + bias + output in f32.
# ----------------------------------------------------------------------------
def fs_linear_kernel(h_ref, w_ref, b_ref, z_ref):
    z_ref[...] = (
        jnp.dot(h_ref[...], w_ref[...], preferred_element_type=jnp.float32)
        + b_ref[...]
    )


# ----------------------------------------------------------------------------
# Kernel 2: BiDAF co-attention for a block of E_BLK edges per grid step.
# src/dst node ids and per-node lengths live in SMEM (scalar prefetch);
# z stays resident in VMEM and is gathered in-kernel.  MXU ops run on bf16
# operands with f32 accumulation; masking / softmax / elementwise stay f32.
# ----------------------------------------------------------------------------
def coattn_kernel(E_BLK, L, DP,
                  src_ref, dst_ref, len_ref,
                  z_ref, watt_ref, wproj_ref, bproj_ref, abias_ref,
                  e_ref):
    base = pl.program_id(0) * E_BLK

    iota_r = lax.broadcasted_iota(jnp.int32, (L, L), 0)   # src position
    iota_c = lax.broadcasted_iota(jnp.int32, (L, L), 1)   # dst position

    xs, ys, masks = [], [], []
    for e in range(E_BLK):                                 # small, unrolled
        s = src_ref[base + e]
        d = dst_ref[base + e]
        xs.append(z_ref[s])                                # (L, DP) f32
        ys.append(z_ref[d])                                # (L, DP) f32
        masks.append((iota_r < len_ref[s]) & (iota_c < len_ref[d]))
    x = jnp.stack(xs)                                      # (E_BLK, L, DP)
    y = jnp.stack(ys)                                      # (E_BLK, L, DP)
    valid = jnp.stack(masks)                               # (E_BLK, L, L) bool
    y_bf = y.astype(jnp.bfloat16)

    w = watt_ref[...]                                      # (3, DP): [w_x, w_y, w_xy]
    ab = abias_ref[0]                                      # SMEM scalar bias

    # LinearMatrixAttention 'x,y,x*y':
    #   S[e,i,j] = x_i.w_x + y_j.w_y + (x_i * w_xy).y_j + bias
    a = jnp.sum(x * w[0:1, :], axis=-1, keepdims=True)                      # (E,L,1)
    c = jnp.sum(y * w[1:2, :], axis=-1)[:, None, :]                         # (E,1,L)
    xy = jnp.einsum('eld,emd->elm',
                    (x * w[2:3, :]).astype(jnp.bfloat16), y_bf,
                    preferred_element_type=jnp.float32)                     # (E,L,L)
    S = a + c + xy + ab
    S = jnp.where(valid, S, MIN_VAL)                                        # masked_fill

    # c2q: softmax over dst positions
    m = jnp.max(S, axis=-1, keepdims=True)                                  # (E,L,1)
    p = jnp.exp(S - m)
    attn = p * pl.reciprocal(jnp.sum(p, axis=-1, keepdims=True), approx=True)
    c2q = jnp.einsum('elm,emd->eld', attn.astype(jnp.bfloat16), y_bf,
                     preferred_element_type=jnp.float32)                    # (E,L,DP)

    # q2c: softmax over src positions of row-max(S)
    bm = jnp.max(m, axis=1, keepdims=True)                                  # (E,1,1)
    pb = jnp.exp(m - bm)                                                    # (E,L,1)
    b = pb * pl.reciprocal(jnp.sum(pb, axis=1, keepdims=True), approx=True)
    q2c = jnp.sum(x * b, axis=1, keepdims=True)                             # (E,1,DP)

    # Projection without materializing G = [x, c2q, x*c2q, x*q2c]:
    # four (E*L, DP) @ (DP, DP) bf16 matmuls accumulated in f32.
    M = E_BLK * L

    def mm(part, k):
        return jnp.dot(part.reshape(M, DP).astype(jnp.bfloat16), wproj_ref[k],
                       preferred_element_type=jnp.float32)

    acc = mm(x, 0) + mm(c2q, 1) + mm(x * c2q, 2) + mm(x * q2c, 3)
    out = acc + bproj_ref[...]
    e_ref[...] = out.reshape(E_BLK, L, DP).astype(e_ref.dtype)

    # TODO(synk): for very small L, lane-pack E_BLK edges into one block-diagonal
    # (E_BLK*L, E_BLK*L) score matrix to make the softmax / score matmul lane-dense.


# ----------------------------------------------------------------------------
# Kernel 3: per-node max over incoming edges, as a 1-D grid over dst-sorted
# edges.  The output BlockSpec index is dst[i] (monotonic), so consecutive
# same-dst steps revisit the same resident output block as a max accumulator.
# ----------------------------------------------------------------------------
def max_reduce_kernel(dst_ref, e_ref, o_ref):
    i = pl.program_id(0)
    prev = dst_ref[jnp.maximum(i - 1, 0)]
    is_first = jnp.logical_or(i == 0, dst_ref[i] != prev)
    e = e_ref[...].astype(jnp.float32)

    @pl.when(is_first)
    def _():
        o_ref[...] = e

    @pl.when(jnp.logical_not(is_first))
    def _():
        o_ref[...] = jnp.maximum(o_ref[...], e)


# ----------------------------------------------------------------------------
# Wrapper (glue: lane-dense padding, dst sort, parameter plumbing)
# ----------------------------------------------------------------------------
def gcat_layer_forward(h, l, src_ids, dst_ids, params, *, e_blk=None):
    bsN, L, D = h.shape
    E = int(src_ids.shape[0])
    W_fs_T, b_fs, w_att, att_bias, W_proj_T, b_proj = params

    # --- pad feature dim to a lane-dense multiple of 128 (zero padding keeps
    #     the first D output columns exactly equal) --------------------------
    DP = max(LANE, ((D + LANE - 1) // LANE) * LANE)
    fpad = DP - D
    h_p = jnp.pad(h, ((0, 0), (0, 0), (0, fpad)))
    W_fs_T_p = jnp.pad(W_fs_T, ((0, fpad), (0, fpad))).astype(jnp.bfloat16)
    b_fs_p = jnp.pad(b_fs, ((0, 0), (0, fpad)))
    w_att_p = jnp.pad(w_att, ((0, 0), (0, fpad)))
    W_proj_p = jnp.pad(W_proj_T.reshape(4, D, D),
                       ((0, 0), (0, fpad), (0, fpad))).astype(jnp.bfloat16)
    b_proj_p = jnp.pad(b_proj, ((0, 0), (0, fpad)))
    abias = jnp.asarray(att_bias, jnp.float32).reshape(1)

    vmem_limit = _vmem_limit_bytes()

    # --- kernel 1: z = fs(h), row-tiled (up to 1024-row tiles) --------------
    rows = bsN * L
    r_blk = min(1024, ((rows + 15) // 16) * 16)
    rows_p = pl.cdiv(rows, r_blk) * r_blk
    h2d = h_p.reshape(rows, DP).astype(jnp.bfloat16)
    if rows_p != rows:
        h2d = jnp.pad(h2d, ((0, rows_p - rows), (0, 0)))
    z2d = pl.pallas_call(
        fs_linear_kernel,
        out_shape=jax.ShapeDtypeStruct((rows_p, DP), jnp.float32),
        grid=(rows_p // r_blk,),
        in_specs=[pl.BlockSpec((r_blk, DP), lambda i: (i, 0)),
                  pl.BlockSpec((DP, DP), lambda i: (0, 0)),
                  pl.BlockSpec((1, DP), lambda i: (0, 0))],
        out_specs=pl.BlockSpec((r_blk, DP), lambda i: (i, 0)),
        compiler_params=pltpu.CompilerParams(
            dimension_semantics=("parallel",), vmem_limit_bytes=vmem_limit),
    )(h2d, W_fs_T_p, b_fs_p)
    z = z2d[:rows].reshape(bsN, L, DP)

    # --- edge preprocessing (glue): sort by dst, pad to edge-block multiple --
    order = jnp.argsort(dst_ids)
    src_s = src_ids[order].astype(jnp.int32)
    dst_s = dst_ids[order].astype(jnp.int32)
    if e_blk is None:
        # fill the MXU M dim (E_BLK*L ~ 256) but keep >= 2 edge-grid steps (v7x).
        e_blk = max(1, min(max(1, 256 // max(L, 1)), pl.cdiv(E, 2)))
    e_pad = pl.cdiv(E, e_blk) * e_blk
    if e_pad != E:
        # duplicate the last sorted edge: padded rows are never read by kernel 3.
        src_s = jnp.concatenate([src_s, jnp.broadcast_to(src_s[-1], (e_pad - E,))])
        dst_s = jnp.concatenate([dst_s, jnp.broadcast_to(dst_s[-1], (e_pad - E,))])
    l32 = l.astype(jnp.int32)

    # --- kernel 2: edge-block co-attention (apply_edges) ---------------------
    # TODO(synk): for graphs where z (bsN*L*DP*4B) stops fitting VMEM (v7x has
    # only 64 MiB), switch the z in_spec to a per-edge data-dependent gather and
    # mark the invariant operands pipeline_mode=pl.Buffered(1).
    e_feat = pl.pallas_call(
        functools.partial(coattn_kernel, e_blk, L, DP),
        out_shape=jax.ShapeDtypeStruct((e_pad, L, DP), jnp.bfloat16),
        grid_spec=pltpu.PrefetchScalarGridSpec(
            num_scalar_prefetch=3,
            grid=(e_pad // e_blk,),
            in_specs=[
                pl.BlockSpec((bsN, L, DP), lambda i, s, d, ln: (0, 0, 0)),   # z resident
                pl.BlockSpec((3, DP), lambda i, s, d, ln: (0, 0)),           # w_att
                pl.BlockSpec((4, DP, DP), lambda i, s, d, ln: (0, 0, 0)),    # W_proj (4 blocks)
                pl.BlockSpec((1, DP), lambda i, s, d, ln: (0, 0)),           # b_proj
                pl.BlockSpec(memory_space=pltpu.MemorySpace.SMEM),           # att_bias
            ],
            out_specs=pl.BlockSpec((e_blk, L, DP), lambda i, s, d, ln: (i, 0, 0)),
        ),
        compiler_params=pltpu.CompilerParams(
            dimension_semantics=("parallel",), vmem_limit_bytes=vmem_limit),
    )(src_s, dst_s, l32, z, w_att_p, W_proj_p, b_proj_p, abias)

    # --- kernel 3: per-node max over incoming edges (update_all, reduce=max) --
    # 1-D grid over the E dst-sorted edges; output block revisited per dst node.
    node_feat = pl.pallas_call(
        max_reduce_kernel,
        out_shape=jax.ShapeDtypeStruct((bsN, L, DP), jnp.float32),
        grid_spec=pltpu.PrefetchScalarGridSpec(
            num_scalar_prefetch=1,
            grid=(E,),
            in_specs=[pl.BlockSpec((1, L, DP), lambda i, dst: (i, 0, 0))],
            out_specs=pl.BlockSpec((1, L, DP), lambda i, dst: (dst[i], 0, 0)),
        ),
        compiler_params=pltpu.CompilerParams(
            dimension_semantics=("arbitrary",), vmem_limit_bytes=vmem_limit),
    )(dst_s, e_feat)

    # Nodes with zero in-degree are never visited by kernel 3: give them the
    # same deterministic MIN_VAL fill the reference uses (cheap elementwise op).
    has_in = jnp.zeros((bsN,), jnp.bool_).at[dst_ids].set(True)
    out = jnp.where(has_in[:, None, None], node_feat[:, :, :D], MIN_VAL)
    return out


def init_params(key, D):
    k1, k2, k3, k4, k5 = jax.random.split(key, 5)
    # fs: Linear(D, D)   (stored pre-transposed so z = h @ W_fs_T + b_fs)
    W_fs_T = jax.random.normal(k1, (D, D), jnp.float32) * 0.1
    b_fs = jax.random.normal(k2, (1, D), jnp.float32) * 0.1
    # LinearMatrixAttention(D, D, 'x,y,x*y'): weight rows [w_x, w_y, w_xy] + scalar bias
    w_att = jax.random.normal(k3, (3, D), jnp.float32) * 0.1
    att_bias = 0.05
    # proj: Linear(4D, D)  (stored pre-transposed: (4D, D))
    W_proj_T = jax.random.normal(k4, (4 * D, D), jnp.float32) * 0.1
    b_proj = jax.random.normal(k5, (1, D), jnp.float32) * 0.1
    return (W_fs_T, b_fs, w_att, att_bias, W_proj_T, b_proj)


# Pure-JAX f32 reference (mirrors the PyTorch forward) for a correctness check.
def gcat_reference(h, l, src_ids, dst_ids, params):
    W_fs_T, b_fs, w_att, att_bias, W_proj_T, b_proj = params
    bsN, L, D = h.shape
    z = h @ W_fs_T + b_fs
    x = z[src_ids]
    y = z[dst_ids]
    pos = jnp.arange(L)
    sv = pos[None, :] < l[src_ids][:, None]
    dv = pos[None, :] < l[dst_ids][:, None]
    valid = sv[:, :, None] & dv[:, None, :]
    a = jnp.sum(x * w_att[0], axis=-1, keepdims=True)
    c = jnp.sum(y * w_att[1], axis=-1)[:, None, :]
    xy = jnp.einsum('eld,emd->elm', x * w_att[2], y)
    S = jnp.where(valid, a + c + xy + att_bias, MIN_VAL)
    attn = jax.nn.softmax(S, axis=-1)
    c2q = jnp.einsum('elm,emd->eld', attn, y)
    b = jax.nn.softmax(jnp.max(S, axis=-1), axis=-1)
    q2c = jnp.einsum('el,eld->ed', b, x)[:, None, :]
    G = jnp.concatenate([x, c2q, x * c2q, x * q2c], axis=-1)
    e = G @ W_proj_T + b_proj
    return jnp.full((bsN, L, D), MIN_VAL, jnp.float32).at[dst_ids].max(e)


if __name__ == "__main__":
    bsN, L, D = 5, 8, 32  # 5 graph nodes, seq len 8, feature dim 32
    key = jax.random.PRNGKey(0)
    kh, kp = jax.random.split(key)

    h = jax.random.normal(kh, (bsN, L, D), jnp.float32)
    l = jnp.array([8, 5, 3, 8, 6], dtype=jnp.int32)          # per-node seq lengths

    # Small directed graph (every node has at least one incoming edge).
    src_ids = jnp.array([0, 1, 2, 3, 4, 1, 2], dtype=jnp.int32)
    dst_ids = jnp.array([1, 2, 3, 4, 0, 0, 1], dtype=jnp.int32)

    params = init_params(kp, D)

    # e_blk auto-picked: E_BLK*L targets 256 but is capped at ceil(E/2) so the
    # edge grid keeps >= 2 steps (v7x megacore).
    out = gcat_layer_forward(h, l, src_ids, dst_ids, params)
    out = jax.block_until_ready(out)

    assert out.shape == (bsN, L, D), out.shape
    assert bool(jnp.all(jnp.isfinite(out)))

    ref = gcat_reference(h, l, src_ids, dst_ids, params)
    # bf16 MXU operands + bf16 edge features give ~1e-2-level deviation vs f32.
    max_err = float(jnp.max(jnp.abs(out - ref)))
    assert max_err < 5e-2, f"max abs error vs reference: {max_err}"
    print("KERNEL_OK")
</pallas_src>

<mosaic_0001>
module attributes {stable_mosaic.version = 11 : i64} {
  func.func @fs_linear_kernel(%arg0: i32, %arg1: memref<48x128xbf16, #tpu.memory_space<vmem>>, %arg2: memref<128x128xbf16, #tpu.memory_space<vmem>>, %arg3: memref<1x128xf32, #tpu.memory_space<vmem>>, %arg4: memref<48x128xf32, #tpu.memory_space<vmem>>) attributes {dimension_semantics = [#tpu.dimension_semantics<parallel>], iteration_bounds = array<i64: 1>, scalar_prefetch = 0 : i64, scratch_operands = 0 : i64, tpu.core_type = #tpu.core_type<tc>, window_params = [{transform_indices = @transform_0, window_bounds = array<i64: 48, 128>}, {pipeline_mode = #tpu.pipeline_mode<synchronous>, transform_indices = @transform_1, window_bounds = array<i64: 128, 128>}, {pipeline_mode = #tpu.pipeline_mode<synchronous>, transform_indices = @transform_2, window_bounds = array<i64: 1, 128>}, {transform_indices = @transform_3, window_bounds = array<i64: 48, 128>}]} {
    %c0 = arith.constant 0 : index
    %c0_0 = arith.constant 0 : index
    %0 = vector.load %arg1[%c0, %c0_0] : memref<48x128xbf16, #tpu.memory_space<vmem>>, vector<48x128xbf16>
    %c0_1 = arith.constant 0 : index
    %c0_2 = arith.constant 0 : index
    %1 = vector.load %arg2[%c0_1, %c0_2] : memref<128x128xbf16, #tpu.memory_space<vmem>>, vector<128x128xbf16>
    %cst = arith.constant dense<0.000000e+00> : vector<48x128xf32>
    %2 = tpu.matmul %0, %1, %cst {dimension_numbers = #tpu.dot_dimension_numbers<[1], [0], [0], [1], [0, 0, 1, 1], [], []>} : vector<48x128xbf16>, vector<128x128xbf16>, vector<48x128xf32> -> vector<48x128xf32>
    %c0_3 = arith.constant 0 : index
    %c0_4 = arith.constant 0 : index
    %3 = vector.load %arg3[%c0_3, %c0_4] : memref<1x128xf32, #tpu.memory_space<vmem>>, vector<1x128xf32>
    %4 = vector.broadcast %3 : vector<1x128xf32> to vector<48x128xf32>
    %5 = arith.addf %2, %4 : vector<48x128xf32>
    %c0_5 = arith.constant 0 : index
    %c0_6 = arith.constant 0 : index
    %6 = vector.load %arg4[%c0_5, %c0_6] : memref<48x128xf32, #tpu.memory_space<vmem>>, vector<48x128xf32>
    tpu.vector_store %arg4[%c0_5, %c0_6], %5 {strides = array<i32>} : memref<48x128xf32, #tpu.memory_space<vmem>>, vector<48x128xf32>,
    return
  }
  func.func @transform_0(%arg0: i32) -> (i32, i32) {
    %c0_i32 = arith.constant 0 : i32
    %c0_i32_0 = arith.constant 0 : i32
    return %arg0, %c0_i32 : i32, i32
  }
  func.func @transform_1(%arg0: i32) -> (i32, i32) {
    %c0_i32 = arith.constant 0 : i32
    %c0_i32_0 = arith.constant 0 : i32
    %c0_i32_1 = arith.constant 0 : i32
    return %c0_i32, %c0_i32_0 : i32, i32
  }
  func.func @transform_2(%arg0: i32) -> (i32, i32) {
    %c0_i32 = arith.constant 0 : i32
    %c0_i32_0 = arith.constant 0 : i32
    %c0_i32_1 = arith.constant 0 : i32
    return %c0_i32, %c0_i32_0 : i32, i32
  }
  func.func @transform_3(%arg0: i32) -> (i32, i32) {
    %c0_i32 = arith.constant 0 : i32
    %c0_i32_0 = arith.constant 0 : i32
    return %arg0, %c0_i32 : i32, i32
  }
}

</mosaic_0001>

<bundles_post_ra>
// kernel: tpu_custom_call.1
= control target key start
LH: loop header
LB: loop body
LE: loop exit
PB: predicated region body
PF: predicated region fallthrough
CT: control target
= control target key end

     0   :  { %8 = vsyncpa [#allocation3], 0  ;;  %s450_s0 = inlined_call_operand.hbm [shape: bf16[48,128], index: 0, kind: input, shape index: {}]   ;;  %s451_s1 = inlined_call_operand.hbm [shape: bf16[128,128], index: 1, kind: input, shape index: {}]   ;;  %s452_s2 = inlined_call_operand.vmem [shape: f32[1,128], index: 2, kind: input, shape index: {}]   ;;  %s453_s3 = inlined_call_operand.hbm [shape: f32[48,128], index: 3, kind: output, shape index: {}]  }
   0x1   :  { %9 = vsyncpa [#allocation6], 0 }
   0x2   :  { %10 = vsyncpa [#allocation4], 0  ;;  %s379_s12 = smov [#allocation2]   ;;  %s307_s16 = scalar_lea.hbm %s450_s0, 384 }
   0x3   :  { %s16_s13 = sshll.u32 %s379_s12, 4  ;;  %p308_p0 = scmp.ne.s32.totalorder %s450_s0, %s307_s16  ;;  %s17_s13 = int_to_ptr.vmem [resolvable:$true] %s16_s13 }
   0x4   :  { %p311_p1 = scmp.lt.u32.totalorder %s307_s16, %s450_s0 }
   0x6   :  { %p313_p2 = pnand %p311_p1, %p308_p0 }
   0x8   :  { %316 = shalt.err (!%p313_p2)
}
   0x9   :  { %s317_s21 = scalar_lea.vmem %s17_s13, 384  ;;  %p322_p4 = scmp.lt.s32.totalorder %s17_s13, %s17_s13 }
   0xa   :  { %p318_p3 = scmp.ne.s32.totalorder %s17_s13, %s317_s21  ;;  %p323_p5 = scmp.lt.s32.totalorder %s317_s21, %s317_s21 }
   0xc   :  { %p324_p6 = por %p323_p5, %p322_p4 }
   0xe   :  { %p325_p7 = pnand %p324_p6, %p318_p3 }
  0x10   :  { %328 = shalt.err (!%p325_p7)
}
  0x11   :  { %s380_s22 = smov 64   ;;  %s381_s23 = smov 4  }
  0x12   :  { %22 = dma.hbm_to_vmem [thread:$0]  %s450_s0, 384, %s17_s13, [#allocation3], %s380_s22, %s380_s22, %s381_s23  }
  0x13   :  { %s382_s26 = smov [#allocation5]   ;;  %s329_s30 = scalar_lea.hbm %s451_s1, 1024 }
  0x14   :  { %s28_s27 = sshll.u32 %s382_s26, 4  ;;  %p330_p8 = scmp.ne.s32.totalorder %s451_s1, %s329_s30  ;;  %s29_s27 = int_to_ptr.vmem [resolvable:$true] %s28_s27 }
  0x15   :  { %p333_p9 = scmp.lt.u32.totalorder %s329_s30, %s451_s1 }
  0x17   :  { %p335_p10 = pnand %p333_p9, %p330_p8 }
  0x19   :  { %338 = shalt.err (!%p335_p10)
}
  0x1a   :  { %s339_s8 = scalar_lea.vmem %s29_s27, 1024  ;;  %p344_p12 = scmp.lt.s32.totalorder %s29_s27, %s29_s27 }
  0x1b   :  { %p340_p11 = scmp.ne.s32.totalorder %s29_s27, %s339_s8  ;;  %p345_p13 = scmp.lt.s32.totalorder %s339_s8, %s339_s8 }
  0x1d   :  { %p346_p0 = por %p345_p13, %p344_p12 }
  0x1f   :  { %p347_p1 = pnand %p346_p0, %p340_p11 }
  0x21   :  { %350 = shalt.err (!%p347_p1)
}
  0x22   :  { %34 = dma.hbm_to_vmem [thread:$0]  %s451_s1, 1024, %s29_s27, [#allocation6], %s380_s22, %s380_s22, %s381_s23  }
  0x23   :  { %373 = dma.done.wait [#allocation3], 384  }
  0x24   :  { %374 = vsyncadd [#allocation3], 4294966912 }
  0x25   :  { %375 = dma.done.wait [#allocation6], 1024  }
  0x26   :  { %376 = vsyncadd [#allocation6], 4294966272  ;;  %v383_v0 = vmov 0.0   ;;  %vm384_vm0 = vmmov 0   ;;  %v296_v1 = vld [vmem:[#allocation5] sm:$0xff]   ;;  %v297_v2 = vld [vmem:[#allocation5 + $0x8] sm:$0xff]  }
  0x27   :  { %271 = vmatprep.subr.bf16.mxu1 %v383_v0  ;;  %243 = vmatprep.subr.bf16.mxu0 %v383_v0  ;;  %v298_v3 = vld [vmem:[#allocation5 + $0x10] sm:$0xff]   ;;  %v299_v4 = vld [vmem:[#allocation5 + $0x18] sm:$0xff]   ;;  %v300_v5 = vld [vmem:[#allocation5 + $0x20] sm:$0xff]   ;;  %s385_s11 = smov [#allocation7]  }
  0x28   :  { %263 = vmatprep.mubr.msk.bf16.mxu1 %vm384_vm0, %v383_v0  ;;  %259 = vmatprep.mubr.msk.bf16.mxu0 %vm384_vm0, %v383_v0  ;;  %v301_v6 = vld [vmem:[#allocation5 + $0x28] sm:$0xff]   ;;  %v302_v7 = vld [vmem:[#allocation5 + $0x30] sm:$0xff]   ;;  %v303_v8 = vld [vmem:[#allocation5 + $0x38] sm:$0xff]   ;;  %s207_s12 = sshll.u32 %s385_s11, 4  ;;  %s208_s12 = int_to_ptr.vmem [resolvable:$true] %s207_s12 }
  0x29   :  { %279 = vmatpush3.bf16.msra.mxu1 %v296_v1  ;;  %244 = vmatpush3.bf16.msra.mxu0 %v296_v1  ;;  %v304_v9 = vld [vmem:[#allocation2 + $0x8] sm:$0xff]   ;;  %v305_v10 = vld [vmem:[#allocation2] sm:$0xff]   ;;  %v306_v11 = vld [vmem:[#allocation2 + $0x10] sm:$0xff]   ;;  %p356_p3 = scmp.lt.s32.totalorder %s208_s12, %s208_s12 }
  0x2a   :  { %272 = vmatprep.subr.bf16.mxu1 %v383_v0  ;;  %245 = vmatprep.subr.bf16.mxu0 %v383_v0  ;;  %v220_v12 = vld [vmem:[%s452_s2] ss:$0 sm:$0xff]  ;;  %s351_s2 = scalar_lea.vmem %s208_s12, 768 }
  0x2b   :  { %p352_p2 = scmp.ne.s32.totalorder %s208_s12, %s351_s2  ;;  %p357_p4 = scmp.lt.s32.totalorder %s351_s2, %s351_s2 }
  0x2d   :  { %280 = vmatpush3.bf16.msra.mxu1 %v297_v2  ;;  %246 = vmatpush3.bf16.msra.mxu0 %v297_v2  ;;  %p358_p5 = por %p357_p4, %p356_p3 }
  0x2e   :  { %273 = vmatprep.subr.bf16.mxu1 %v383_v0  ;;  %247 = vmatprep.subr.bf16.mxu0 %v383_v0 }
  0x2f   :  { %p359_p6 = pnand %p358_p5, %p352_p2 }
  0x31   :  { %281 = vmatpush3.bf16.msra.mxu1 %v298_v3  ;;  %248 = vmatpush3.bf16.msra.mxu0 %v298_v3 }
  0x32   :  { %274 = vmatprep.subr.bf16.mxu1 %v383_v0  ;;  %249 = vmatprep.subr.bf16.mxu0 %v383_v0 }
  0x35   :  { %282 = vmatpush3.bf16.msra.mxu1 %v299_v4  ;;  %250 = vmatpush3.bf16.msra.mxu0 %v299_v4 }
  0x36   :  { %275 = vmatprep.subr.bf16.mxu1 %v383_v0  ;;  %251 = vmatprep.subr.bf16.mxu0 %v383_v0 }
  0x39   :  { %283 = vmatpush3.bf16.msra.mxu1 %v300_v5  ;;  %252 = vmatpush3.bf16.msra.mxu0 %v300_v5 }
  0x3a   :  { %276 = vmatprep.subr.bf16.mxu1 %v383_v0  ;;  %253 = vmatprep.subr.bf16.mxu0 %v383_v0 }
  0x3d   :  { %284 = vmatpush3.bf16.msra.mxu1 %v301_v6  ;;  %254 = vmatpush3.bf16.msra.mxu0 %v301_v6 }
  0x3e   :  { %277 = vmatprep.subr.bf16.mxu1 %v383_v0  ;;  %255 = vmatprep.subr.bf16.mxu0 %v383_v0 }
  0x41   :  { %285 = vmatpush3.bf16.msra.mxu1 %v302_v7  ;;  %256 = vmatpush3.bf16.msra.mxu0 %v302_v7 }
  0x42   :  { %278 = vmatprep.subr.bf16.mxu1 %v383_v0  ;;  %257 = vmatprep.subr.bf16.mxu0 %v383_v0 }
  0x45   :  { %286 = vmatpush3.bf16.msra.mxu1 %v303_v8  ;;  %258 = vmatpush3.bf16.msra.mxu0 %v303_v8 }
  0x48   :  { %264 = vmatmul.mubr.bf16.vlgmr.msra.gmra.mrb[0].mxu1 %v304_v9  ;;  %260 = vmatmul.mubr.bf16.vlgmr.msra.gmra.mrb[0].mxu0 %v305_v10 }
  0x49   :  { %267 = vmatprep.mubr.msk.bf16.mxu1 %vm384_vm0, %v383_v0 }
  0x50   :  { %268 = vmatmul.mubr.bf16.gmra.mrb[4].mxu1 %v306_v11 }
 0x11b   :  { %v181_v13 = vpop.f32.mrb[0].mxu1  ;;  %v173_v14 = vpop.f32.mrb[0].mxu0 }
 0x11c   :  { %v182_v15 = vadd.f32 %v220_v12, %v181_v13  ;;  %v265_v16 = vpop.f32.mrb[1].mxu1  ;;  %v174_v17 = vadd.f32 %v220_v12, %v173_v14  ;;  %v261_v18 = vpop.f32.mrb[1].mxu0 }
 0x11d   :  { %v184_v19 = vpop.f32.mrb[2].mxu1  ;;  %v176_v20 = vpop.f32.mrb[2].mxu0 }
 0x11e   :  { %198 = vst [vmem:[#allocation7 + $0x10] sm:$0xff] %v182_v15  ;;  %v185_v21 = vadd.f32 %v220_v12, %v184_v19  ;;  %v266_v22 = vpop.f32.mrb[3].mxu1  ;;  %196 = vst [vmem:[#allocation7] sm:$0xff] %v174_v17  ;;  %v177_v23 = vadd.f32 %v220_v12, %v176_v20  ;;  %v262_v24 = vpop.f32.mrb[3].mxu0 }
 0x120   :  { %199 = vst [vmem:[#allocation7 + $0x18] sm:$0xff] %v185_v21  ;;  %197 = vst [vmem:[#allocation7 + $0x8] sm:$0xff] %v177_v23 }
 0x123   :  { %v189_v25 = vpop.f32.mrb[4].mxu1 }
 0x124   :  { %v190_v26 = vadd.f32 %v220_v12, %v189_v25  ;;  %v269_v27 = vpop.f32.mrb[5].mxu1 }
 0x125   :  { %v192_v28 = vpop.f32.mrb[6].mxu1 }
 0x126   :  { %200 = vst [vmem:[#allocation7 + $0x20] sm:$0xff] %v190_v26  ;;  %v193_v29 = vadd.f32 %v220_v12, %v192_v28  ;;  %v270_v30 = vpop.f32.mrb[7].mxu1 }
 0x128   :  { %201 = vst [vmem:[#allocation7 + $0x28] sm:$0xff] %v193_v29 }
 0x129   :  { %362 = shalt.err (!%p359_p6)
}
 0x12a   :  { %s363_s15 = scalar_lea.hbm %s453_s3, 768 }
 0x12b   :  { %p364_p7 = scmp.ne.s32.totalorder %s453_s3, %s363_s15  ;;  %p367_p8 = scmp.lt.u32.totalorder %s363_s15, %s453_s3 }
 0x12d   :  { %p369_p9 = pnand %p367_p8, %p364_p7 }
 0x12f   :  { %372 = shalt.err (!%p369_p9)
}
 0x130   :  { %s386_s20 = smov 128   ;;  %s387_s21 = smov 8  }
 0x131   :  { %213 = dma.vmem_to_hbm [thread:$0]  %s208_s12, 768, %s453_s3, [#allocation4], %s386_s20, %s386_s20, %s387_s21  }
 0x132   :  { %377 = dma.done.wait [#allocation4], 768  }
 0x133   :  { %378 = vsyncadd [#allocation4], 4294966528 }
 0x134   :  { %217 = vsyncpa [#allocation3], 1 }
 0x135   :  { %218 = vsyncpa [#allocation6], 1 }
 0x136   :  { %219 = vsyncpa [#allocation4], 1 }

</bundles_post_ra>
